<compile_context>
chip_gen: v5e
topology: v5e:2x2
jax: 0.10.0
libtpu: 0.0.40
codegen_flags: <defaults>
</compile_context>

<pallas_src>
import functools

import jax
import jax.numpy as jnp
import numpy as np
from jax.experimental import pallas as pl
from jax.experimental.pallas import tpu as pltpu

EPS = 1e-5
INTERSTAGE_DTYPE = jnp.bfloat16   # inter-stage activations / MXU operands


# ----------------------------------------------------------------------------
# Pallas kernels
# ----------------------------------------------------------------------------
def _fused_1x1_kernel(x_ref, w_ref, ybr_ref, ytl_ref, s_ref, q_ref, *, c_br):
    # x: (1, Cin, ttv) f32   w: (c_tot, Cin) bf16  ->  y: (c_tot, ttv) f32
    x = x_ref[0].astype(w_ref.dtype)
    y = jnp.dot(w_ref[...], x, preferred_element_type=jnp.float32)
    ybr_ref[0] = y[:c_br].astype(ybr_ref.dtype)      # branches 1..5 (pre-BN1)
    ytl_ref[0] = y[c_br:].astype(ytl_ref.dtype)      # [1x1 branch | residual] (pre-BN)
    s_ref[0, 0] = jnp.sum(y, axis=1, keepdims=True)        # per-channel partial sum
    q_ref[0, 0] = jnp.sum(y * y, axis=1, keepdims=True)    # partial sum of squares


def _temporal_stage_kernel(y_ref, s1_ref, t1_ref, wt_ref, z_ref, s_ref, q_ref,
                           *, T, V, shifts, pmax, nb, bc):
    # y: (1, c_br, T*V)   s1/t1: (c_br, 1)   wt: (nb*bc, n_shift*c_br)
    lo, hi = pmax * V, pmax * V + T * V
    # BN1 + ReLU, channels-major (lane-dense VPU work), f32.
    h = jnp.maximum(y_ref[0].astype(jnp.float32) * s1_ref[...] + t1_ref[...], 0.0)
    # One shared zero-padded time buffer; a time shift by s is a lane shift by s*V.
    zpad = jnp.zeros((h.shape[0], pmax * V), wt_ref.dtype)
    hp = jnp.concatenate([zpad, h.astype(wt_ref.dtype), zpad], axis=1)
    slabs = [hp[:, lo + s * V:hi + s * V] for s in shifts]           # (c_br, T*V) each
    # All dilated temporal convs as ONE matmul: the block-structured weight's zero
    # pattern performs the per-branch channel / tap / dilation selection.
    cols = jnp.concatenate(slabs, axis=0)                            # (n_sh*c_br, T*V)
    zt = jnp.dot(wt_ref[...], cols, preferred_element_type=jnp.float32)  # (nb*bc, T*V)
    # Max-pool branch, kernel (3,1) stride 1 pad 1.  h >= 0 post-ReLU, so the zero
    # padding is equivalent to torch's -inf padding.
    m3 = jnp.maximum(jnp.maximum(slabs[shifts.index(-1)], slabs[shifts.index(0)]),
                     slabs[shifts.index(1)])
    z = jnp.concatenate([zt, m3[nb * bc:, :].astype(jnp.float32)], axis=0)  # (c_br, T*V)
    z_ref[0] = z.astype(z_ref.dtype)
    s_ref[0] = jnp.sum(z, axis=1, keepdims=True)
    q_ref[0] = jnp.sum(z * z, axis=1, keepdims=True)


def _final_fuse_kernel(z_ref, yt_ref, s2_ref, t2_ref, st_ref, tt_ref, o_ref, *, bc):
    # z: (1, c_br, T*V) stage-2 output;  yt: (1, c_tail, T*V) = [1x1 branch | residual]
    zb = z_ref[0].astype(jnp.float32) * s2_ref[...] + t2_ref[...]   # BN2 (branches+pool)
    yt = yt_ref[0].astype(jnp.float32) * st_ref[...] + tt_ref[...]  # BN1(1x1) | BN(res)
    o_ref[0] = jnp.concatenate([zb, yt[:bc]], axis=0) + yt[bc:]     # concat + residual


# ----------------------------------------------------------------------------
# Small helpers (plain-JAX glue on per-channel vectors only)
# ----------------------------------------------------------------------------
def _pick_tv_tile(tv, target=2048):
    """Lane-dense tile of the T*V axis: largest multiple-of-128 divisor <= target
    (falls back to the full axis when it is not 128-aligned)."""
    if tv % 128 != 0:
        return tv
    best = 128
    for cand in range(128, min(tv, target) + 1, 128):
        if tv % cand == 0:
            best = cand
    return best


def _moments(psum, psumsq, count):
    total = jnp.sum(psum, axis=0)
    total_sq = jnp.sum(psumsq, axis=0)
    mean = total / count
    var = jnp.maximum(total_sq / count - mean * mean, 0.0)   # biased (torch training)
    return mean, var


def _bn_fold(gamma, beta, mean, var):
    scale = gamma / jnp.sqrt(var + EPS)
    shift = beta - mean * scale
    return scale, shift


# ----------------------------------------------------------------------------
# MultiScale_TemporalConv forward (Pallas)
# ----------------------------------------------------------------------------
def multiscale_temporal_conv_pallas(x_nchw, params):
    N, Cin, T, V = x_nchw.shape
    branches = params["branches_tconv"]
    nb = len(branches)
    bc = branches[0]["g1"].shape[0]
    out_c = params["residual"]["g"].shape[0]
    c_br = (nb + 1) * bc            # temporal + pool branch channels (stage-2 input)
    c_tail = bc + out_c             # [1x1 branch | residual] channels
    c_tot = c_br + c_tail
    K = branches[0]["K"]
    TV = T * V
    count = float(N * TV)
    cdt = INTERSTAGE_DTYPE

    # ---- fold ALL 1x1 conv weights (6 branches + residual) into one matmul --------
    # (conv biases are dropped: each feeds a training-mode BN, which cancels them.)
    w_rows = [bp["w1_4d"][:, :, 0, 0] for bp in branches]
    w_rows += [params["branch_pool"]["w1_4d"][:, :, 0, 0],
               params["branch_1x1"]["w1_4d"][:, :, 0, 0],
               params["residual"]["w_4d"][:, :, 0, 0]]
    w_all = jnp.concatenate(w_rows, axis=0).astype(cdt)             # (c_tot, Cin)

    g1_all = jnp.concatenate(
        [bp["g1"] for bp in branches]
        + [params["branch_pool"]["g1"], params["branch_1x1"]["g1"],
           params["residual"]["g"]])
    be1_all = jnp.concatenate(
        [bp["be1"] for bp in branches]
        + [params["branch_pool"]["be1"], params["branch_1x1"]["be1"],
           params["residual"]["be"]])

    # channels-major, lane-dense layout (N, C, T*V): reshapes only, no transposes.
    x3 = x_nchw.reshape(N, Cin, TV)
    ttv = _pick_tv_tile(TV)
    g_tv = TV // ttv

    # -------- Kernel A: fused wide 1x1 conv + BN1 partial moments -------------------
    kern_a = functools.partial(_fused_1x1_kernel, c_br=c_br)
    y_br, y_tl, ps1, pq1 = pl.pallas_call(
        kern_a,
        out_shape=(
            jax.ShapeDtypeStruct((N, c_br, TV), cdt),
            jax.ShapeDtypeStruct((N, c_tail, TV), cdt),
            jax.ShapeDtypeStruct((N, g_tv, c_tot, 1), jnp.float32),
            jax.ShapeDtypeStruct((N, g_tv, c_tot, 1), jnp.float32),
        ),
        grid=(N, g_tv),
        in_specs=[
            pl.BlockSpec((1, Cin, ttv), lambda n, j: (n, 0, j)),
            pl.BlockSpec((c_tot, Cin), lambda n, j: (0, 0)),
        ],
        out_specs=(
            pl.BlockSpec((1, c_br, ttv), lambda n, j: (n, 0, j)),
            pl.BlockSpec((1, c_tail, ttv), lambda n, j: (n, 0, j)),
            pl.BlockSpec((1, 1, c_tot, 1), lambda n, j: (n, j, 0, 0)),
            pl.BlockSpec((1, 1, c_tot, 1), lambda n, j: (n, j, 0, 0)),
        ),
        compiler_params=pltpu.CompilerParams(
            dimension_semantics=("parallel", "parallel")),
    )(x3, w_all)

    mean1, var1 = _moments(ps1.reshape(N * g_tv, c_tot),
                           pq1.reshape(N * g_tv, c_tot), count)
    scale1, shift1 = _bn_fold(g1_all, be1_all, mean1, var1)
    s1_br = scale1[:c_br].reshape(c_br, 1)
    t1_br = shift1[:c_br].reshape(c_br, 1)
    s1_tl = scale1[c_br:].reshape(c_tail, 1)
    t1_tl = shift1[c_br:].reshape(c_tail, 1)

    # ---- fused temporal-conv weight: one block-structured (nb*bc, n_sh*c_br) ------
    shift_set = {-1, 0, 1}                      # {-1,0,1} needed by the max-pool too
    tap_shift = []
    for bp in branches:
        d = bp["dil"]
        p = (K + (K - 1) * (d - 1) - 1) // 2
        row = [k * d - p for k in range(K)]
        tap_shift.append(row)
        shift_set.update(row)
    shifts = tuple(sorted(shift_set))
    n_sh = len(shifts)
    pmax = max(abs(s) for s in shifts)

    wt_big = jnp.zeros((nb * bc, n_sh, c_br), jnp.float32)
    for i, bp in enumerate(branches):
        for k in range(K):
            sidx = shifts.index(tap_shift[i][k])
            wt_big = wt_big.at[i * bc:(i + 1) * bc, sidx,
                               i * bc:(i + 1) * bc].set(bp["wt_4d"][:, :, k, 0])
    wt_big = wt_big.reshape(nb * bc, n_sh * c_br).astype(cdt)

    # -------- Kernel B: BN1+ReLU -> fused dilated convs + maxpool + BN2 moments ----
    # NOTE(v7x): with tiny N the (N,) grid gives few steps per core; for production
    # shapes add a T-tile grid axis with a pmax halo to deepen the pipeline.
    kern_b = functools.partial(_temporal_stage_kernel, T=T, V=V, shifts=shifts,
                               pmax=pmax, nb=nb, bc=bc)
    z, ps2, pq2 = pl.pallas_call(
        kern_b,
        out_shape=(
            jax.ShapeDtypeStruct((N, c_br, TV), cdt),
            jax.ShapeDtypeStruct((N, c_br, 1), jnp.float32),
            jax.ShapeDtypeStruct((N, c_br, 1), jnp.float32),
        ),
        grid=(N,),
        in_specs=[
            pl.BlockSpec((1, c_br, TV), lambda n: (n, 0, 0)),
            pl.BlockSpec((c_br, 1), lambda n: (0, 0)),
            pl.BlockSpec((c_br, 1), lambda n: (0, 0)),
            pl.BlockSpec((nb * bc, n_sh * c_br), lambda n: (0, 0)),
        ],
        out_specs=(
            pl.BlockSpec((1, c_br, TV), lambda n: (n, 0, 0)),
            pl.BlockSpec((1, c_br, 1), lambda n: (n, 0, 0)),
            pl.BlockSpec((1, c_br, 1), lambda n: (n, 0, 0)),
        ),
        compiler_params=pltpu.CompilerParams(dimension_semantics=("parallel",)),
    )(y_br, s1_br, t1_br, wt_big)

    g2_all = jnp.concatenate([bp["g2"] for bp in branches]
                             + [params["branch_pool"]["g2"]])
    be2_all = jnp.concatenate([bp["be2"] for bp in branches]
                              + [params["branch_pool"]["be2"]])
    mean2, var2 = _moments(ps2.reshape(N, c_br), pq2.reshape(N, c_br), count)
    scale2, shift2 = _bn_fold(g2_all, be2_all, mean2, var2)

    # -------- Kernel C: BN2 + channel concat + residual add, straight to NCHW ------
    kern_c = functools.partial(_final_fuse_kernel, bc=bc)
    out = pl.pallas_call(
        kern_c,
        out_shape=jax.ShapeDtypeStruct((N, out_c, TV), jnp.float32),
        grid=(N,),
        in_specs=[
            pl.BlockSpec((1, c_br, TV), lambda n: (n, 0, 0)),
            pl.BlockSpec((1, c_tail, TV), lambda n: (n, 0, 0)),
            pl.BlockSpec((c_br, 1), lambda n: (0, 0)),
            pl.BlockSpec((c_br, 1), lambda n: (0, 0)),
            pl.BlockSpec((c_tail, 1), lambda n: (0, 0)),
            pl.BlockSpec((c_tail, 1), lambda n: (0, 0)),
        ],
        out_specs=pl.BlockSpec((1, out_c, TV), lambda n: (n, 0, 0)),
        compiler_params=pltpu.CompilerParams(dimension_semantics=("parallel",)),
    )(z, y_tl, scale2.reshape(c_br, 1), shift2.reshape(c_br, 1), s1_tl, t1_tl)

    return out.reshape(N, out_c, T, V)     # already NCHW: reshape only, no transpose


# ----------------------------------------------------------------------------
# Deterministic parameter init (mirrors weights_init)
# ----------------------------------------------------------------------------
def _kaiming_normal_fanout(key, shape):  # shape = (O, I, kh, kw)
    fan_out = shape[0] * shape[2] * shape[3]
    std = (2.0 / fan_out) ** 0.5
    return std * jax.random.normal(key, shape, dtype=jnp.float32)


def _bn_gamma(key, c):
    return 1.0 + 0.02 * jax.random.normal(key, (c,), dtype=jnp.float32)


def init_params(key, in_c, out_c, ks, dilations):
    n_br = len(dilations) + 2
    assert out_c % n_br == 0
    bc = out_c // n_br
    keys = iter(jax.random.split(key, 64))
    z = lambda c: jnp.zeros((c,), jnp.float32)

    params = {"branches_tconv": []}
    for d in dilations:
        params["branches_tconv"].append(
            dict(
                w1_4d=_kaiming_normal_fanout(next(keys), (bc, in_c, 1, 1)),
                b1=z(bc),
                g1=_bn_gamma(next(keys), bc),
                be1=z(bc),
                wt_4d=_kaiming_normal_fanout(next(keys), (bc, bc, ks, 1)),
                bt=z(bc),
                g2=_bn_gamma(next(keys), bc),
                be2=z(bc),
                K=ks,
                dil=d,
            )
        )
    params["branch_pool"] = dict(
        w1_4d=_kaiming_normal_fanout(next(keys), (bc, in_c, 1, 1)),
        b1=z(bc),
        g1=_bn_gamma(next(keys), bc),
        be1=z(bc),
        g2=_bn_gamma(next(keys), bc),
        be2=z(bc),
    )
    params["branch_1x1"] = dict(
        w1_4d=_kaiming_normal_fanout(next(keys), (bc, in_c, 1, 1)),
        b1=z(bc),
        g1=_bn_gamma(next(keys), bc),
        be1=z(bc),
    )
    params["residual"] = dict(
        w_4d=_kaiming_normal_fanout(next(keys), (out_c, in_c, 1, 1)),
        b=z(out_c),
        g=_bn_gamma(next(keys), out_c),
        be=z(out_c),
    )
    return params


# ----------------------------------------------------------------------------
# Pure-JAX reference (torch semantics, NCHW) for verification
# ----------------------------------------------------------------------------
def ref_forward(x, params):
    def conv(x, w, b, pad=0, dil=1):
        y = jax.lax.conv_general_dilated(
            x, w,
            window_strides=(1, 1),
            padding=((pad, pad), (0, 0)),
            rhs_dilation=(dil, 1),
            dimension_numbers=("NCHW", "OIHW", "NCHW"),
        )
        return y + b.reshape(1, -1, 1, 1)

    def bn(x, g, b):
        mean = jnp.mean(x, axis=(0, 2, 3), keepdims=True)
        var = jnp.var(x, axis=(0, 2, 3), keepdims=True)  # biased
        return g.reshape(1, -1, 1, 1) * (x - mean) / jnp.sqrt(var + EPS) + b.reshape(
            1, -1, 1, 1)

    outs = []
    for bp in params["branches_tconv"]:
        h = jax.nn.relu(bn(conv(x, bp["w1_4d"], bp["b1"]), bp["g1"], bp["be1"]))
        pad = (bp["K"] + (bp["K"] - 1) * (bp["dil"] - 1) - 1) // 2
        h = conv(h, bp["wt_4d"], bp["bt"], pad=pad, dil=bp["dil"])
        outs.append(bn(h, bp["g2"], bp["be2"]))

    bp = params["branch_pool"]
    h = jax.nn.relu(bn(conv(x, bp["w1_4d"], bp["b1"]), bp["g1"], bp["be1"]))
    T = h.shape[2]
    hp = jnp.pad(h, ((0, 0), (0, 0), (1, 1), (0, 0)), constant_values=-jnp.inf)
    h = jnp.maximum(jnp.maximum(hp[:, :, 0:T], hp[:, :, 1:T + 1]), hp[:, :, 2:T + 2])
    outs.append(bn(h, bp["g2"], bp["be2"]))

    bp = params["branch_1x1"]
    outs.append(bn(conv(x, bp["w1_4d"], bp["b1"]), bp["g1"], bp["be1"]))

    out = jnp.concatenate(outs, axis=1)
    rp = params["residual"]
    res = bn(conv(x, rp["w_4d"], rp["b"]), rp["g"], rp["be"])
    return out + res


# ----------------------------------------------------------------------------
if __name__ == "__main__":
    in_c, out_c = 8, 12          # 12 % 6 branches == 0 -> branch_channels = 2
    N, T, V = 2, 16, 16          # (batch, time, vertices)

    x = jax.random.normal(jax.random.PRNGKey(0), (N, in_c, T, V), dtype=jnp.float32)
    params = init_params(jax.random.PRNGKey(42), in_c, out_c, 3, [1, 2, 3, 4])

    fwd = jax.jit(lambda a: multiscale_temporal_conv_pallas(a, params))
    y = jax.block_until_ready(fwd(x))
    assert y.shape == (N, out_c, T, V)

    y_ref = ref_forward(x, params)
    # bf16 inter-stage activations give ~1% agreement with the f32 reference
    # (set INTERSTAGE_DTYPE = jnp.float32 to tighten to ~1e-5).
    np.testing.assert_allclose(np.asarray(y), np.asarray(y_ref), rtol=5e-2, atol=5e-2)

    print("KERNEL_OK")
</pallas_src>

<mosaic_0001>
module attributes {stable_mosaic.version = 11 : i64} {
  func.func @_fused_1x1_kernel(%arg0: i32, %arg1: i32, %arg2: memref<1x8x256xf32, #tpu.memory_space<vmem>>, %arg3: memref<24x8xbf16, #tpu.memory_space<vmem>>, %arg4: memref<1x10x256xbf16, #tpu.memory_space<vmem>>, %arg5: memref<1x14x256xbf16, #tpu.memory_space<vmem>>, %arg6: memref<1x1x24x1xf32, #tpu.memory_space<vmem>>, %arg7: memref<1x1x24x1xf32, #tpu.memory_space<vmem>>) attributes {dimension_semantics = [#tpu.dimension_semantics<parallel>, #tpu.dimension_semantics<parallel>], iteration_bounds = array<i64: 2, 1>, scalar_prefetch = 0 : i64, scratch_operands = 0 : i64, tpu.core_type = #tpu.core_type<tc>, window_params = [{transform_indices = @transform_0, window_bounds = array<i64: 1, 8, 256>}, {pipeline_mode = #tpu.pipeline_mode<synchronous>, transform_indices = @transform_1, window_bounds = array<i64: 24, 8>}, {transform_indices = @transform_2, window_bounds = array<i64: 1, 10, 256>}, {transform_indices = @transform_3, window_bounds = array<i64: 1, 14, 256>}, {transform_indices = @transform_4, window_bounds = array<i64: 1, 1, 24, 1>}, {transform_indices = @transform_5, window_bounds = array<i64: 1, 1, 24, 1>}]} {
    %c0 = arith.constant 0 : index
    %c0_0 = arith.constant 0 : index
    %c0_1 = arith.constant 0 : index
    %0 = vector.load %arg2[%c0, %c0_0, %c0_1] : memref<1x8x256xf32, #tpu.memory_space<vmem>>, vector<1x8x256xf32>
    %1 = vector.shape_cast %0 : vector<1x8x256xf32> to vector<8x256xf32>
    %2 = arith.truncf %1 : vector<8x256xf32> to vector<8x256xbf16>
    %c0_2 = arith.constant 0 : index
    %c0_3 = arith.constant 0 : index
    %3 = vector.load %arg3[%c0_2, %c0_3] : memref<24x8xbf16, #tpu.memory_space<vmem>>, vector<24x8xbf16>
    %cst = arith.constant dense<0.000000e+00> : vector<24x256xf32>
    %4 = tpu.matmul %3, %2, %cst {dimension_numbers = #tpu.dot_dimension_numbers<[1], [0], [0], [1], [0, 0, 1, 1], [], []>} : vector<24x8xbf16>, vector<8x256xbf16>, vector<24x256xf32> -> vector<24x256xf32>
    %5 = vector.extract_strided_slice %4 {offsets = [0, 0], sizes = [10, 256], strides = [1, 1]} : vector<24x256xf32> to vector<10x256xf32>
    %6 = arith.truncf %5 : vector<10x256xf32> to vector<10x256xbf16>
    %c0_4 = arith.constant 0 : index
    %c0_5 = arith.constant 0 : index
    %c0_6 = arith.constant 0 : index
    %7 = vector.load %arg4[%c0_4, %c0_5, %c0_6] : memref<1x10x256xbf16, #tpu.memory_space<vmem>>, vector<1x10x256xbf16>
    %8 = vector.shape_cast %7 : vector<1x10x256xbf16> to vector<10x256xbf16>
    %9 = vector.shape_cast %6 : vector<10x256xbf16> to vector<1x10x256xbf16>
    tpu.vector_store %arg4[%c0_4, %c0_5, %c0_6], %9 {strides = array<i32>} : memref<1x10x256xbf16, #tpu.memory_space<vmem>>, vector<1x10x256xbf16>,
    %10 = vector.extract_strided_slice %4 {offsets = [10, 0], sizes = [14, 256], strides = [1, 1]} : vector<24x256xf32> to vector<14x256xf32>
    %11 = arith.truncf %10 : vector<14x256xf32> to vector<14x256xbf16>
    %c0_7 = arith.constant 0 : index
    %c0_8 = arith.constant 0 : index
    %c0_9 = arith.constant 0 : index
    %12 = vector.load %arg5[%c0_7, %c0_8, %c0_9] : memref<1x14x256xbf16, #tpu.memory_space<vmem>>, vector<1x14x256xbf16>
    %13 = vector.shape_cast %12 : vector<1x14x256xbf16> to vector<14x256xbf16>
    %14 = vector.shape_cast %11 : vector<14x256xbf16> to vector<1x14x256xbf16>
    tpu.vector_store %arg5[%c0_7, %c0_8, %c0_9], %14 {strides = array<i32>} : memref<1x14x256xbf16, #tpu.memory_space<vmem>>, vector<1x14x256xbf16>,
    %cst_10 = arith.constant dense<0.000000e+00> : vector<24xf32>
    %15 = vector.multi_reduction <add>, %4, %cst_10 [1] : vector<24x256xf32> to vector<24xf32>
    %16 = vector.shape_cast %15 : vector<24xf32> to vector<24x1xf32>
    %c0_11 = arith.constant 0 : index
    %c0_12 = arith.constant 0 : index
    %c0_13 = arith.constant 0 : index
    %c0_14 = arith.constant 0 : index
    %17 = vector.load %arg6[%c0_11, %c0_12, %c0_13, %c0_14] : memref<1x1x24x1xf32, #tpu.memory_space<vmem>>, vector<1x1x24x1xf32>
    %18 = vector.shape_cast %17 : vector<1x1x24x1xf32> to vector<24x1xf32>
    %19 = vector.shape_cast %16 : vector<24x1xf32> to vector<1x1x24x1xf32>
    tpu.vector_store %arg6[%c0_11, %c0_12, %c0_13, %c0_14], %19 {strides = array<i32>} : memref<1x1x24x1xf32, #tpu.memory_space<vmem>>, vector<1x1x24x1xf32>,
    %20 = arith.mulf %4, %4 : vector<24x256xf32>
    %cst_15 = arith.constant dense<0.000000e+00> : vector<24xf32>
    %21 = vector.multi_reduction <add>, %20, %cst_15 [1] : vector<24x256xf32> to vector<24xf32>
    %22 = vector.shape_cast %21 : vector<24xf32> to vector<24x1xf32>
    %c0_16 = arith.constant 0 : index
    %c0_17 = arith.constant 0 : index
    %c0_18 = arith.constant 0 : index
    %c0_19 = arith.constant 0 : index
    %23 = vector.load %arg7[%c0_16, %c0_17, %c0_18, %c0_19] : memref<1x1x24x1xf32, #tpu.memory_space<vmem>>, vector<1x1x24x1xf32>
    %24 = vector.shape_cast %23 : vector<1x1x24x1xf32> to vector<24x1xf32>
    %25 = vector.shape_cast %22 : vector<24x1xf32> to vector<1x1x24x1xf32>
    tpu.vector_store %arg7[%c0_16, %c0_17, %c0_18, %c0_19], %25 {strides = array<i32>} : memref<1x1x24x1xf32, #tpu.memory_space<vmem>>, vector<1x1x24x1xf32>,
    return
  }
  func.func @transform_0(%arg0: i32, %arg1: i32) -> (i32, i32, i32) {
    %c0_i32 = arith.constant 0 : i32
    %c0_i32_0 = arith.constant 0 : i32
    return %arg0, %c0_i32, %arg1 : i32, i32, i32
  }
  func.func @transform_1(%arg0: i32, %arg1: i32) -> (i32, i32) {
    %c0_i32 = arith.constant 0 : i32
    %c0_i32_0 = arith.constant 0 : i32
    %c0_i32_1 = arith.constant 0 : i32
    return %c0_i32, %c0_i32_0 : i32, i32
  }
  func.func @transform_2(%arg0: i32, %arg1: i32) -> (i32, i32, i32) {
    %c0_i32 = arith.constant 0 : i32
    %c0_i32_0 = arith.constant 0 : i32
    return %arg0, %c0_i32, %arg1 : i32, i32, i32
  }
  func.func @transform_3(%arg0: i32, %arg1: i32) -> (i32, i32, i32) {
    %c0_i32 = arith.constant 0 : i32
    %c0_i32_0 = arith.constant 0 : i32
    return %arg0, %c0_i32, %arg1 : i32, i32, i32
  }
  func.func @transform_4(%arg0: i32, %arg1: i32) -> (i32, i32, i32, i32) {
    %c0_i32 = arith.constant 0 : i32
    %c0_i32_0 = arith.constant 0 : i32
    %c0_i32_1 = arith.constant 0 : i32
    return %arg0, %arg1, %c0_i32, %c0_i32_0 : i32, i32, i32, i32
  }
  func.func @transform_5(%arg0: i32, %arg1: i32) -> (i32, i32, i32, i32) {
    %c0_i32 = arith.constant 0 : i32
    %c0_i32_0 = arith.constant 0 : i32
    %c0_i32_1 = arith.constant 0 : i32
    return %arg0, %arg1, %c0_i32, %c0_i32_0 : i32, i32, i32, i32
  }
}

module attributes {stable_mosaic.version = 11 : i64} {
  func.func @_temporal_stage_kernel(%arg0: i32, %arg1: memref<1x10x256xbf16, #tpu.memory_space<vmem>>, %arg2: memref<10x1xf32, #tpu.memory_space<vmem>>, %arg3: memref<10x1xf32, #tpu.memory_space<vmem>>, %arg4: memref<8x90xbf16, #tpu.memory_space<vmem>>, %arg5: memref<1x10x256xbf16, #tpu.memory_space<vmem>>, %arg6: memref<1x10x1xf32, #tpu.memory_space<vmem>>, %arg7: memref<1x10x1xf32, #tpu.memory_space<vmem>>) attributes {dimension_semantics = [#tpu.dimension_semantics<parallel>], iteration_bounds = array<i64: 2>, scalar_prefetch = 0 : i64, scratch_operands = 0 : i64, tpu.core_type = #tpu.core_type<tc>, window_params = [{transform_indices = @transform_0, window_bounds = array<i64: 1, 10, 256>}, {pipeline_mode = #tpu.pipeline_mode<synchronous>, transform_indices = @transform_1, window_bounds = array<i64: 10, 1>}, {pipeline_mode = #tpu.pipeline_mode<synchronous>, transform_indices = @transform_2, window_bounds = array<i64: 10, 1>}, {pipeline_mode = #tpu.pipeline_mode<synchronous>, transform_indices = @transform_3, window_bounds = array<i64: 8, 90>}, {transform_indices = @transform_4, window_bounds = array<i64: 1, 10, 256>}, {transform_indices = @transform_5, window_bounds = array<i64: 1, 10, 1>}, {transform_indices = @transform_6, window_bounds = array<i64: 1, 10, 1>}]} {
    %c0 = arith.constant 0 : index
    %c0_0 = arith.constant 0 : index
    %c0_1 = arith.constant 0 : index
    %0 = vector.load %arg1[%c0, %c0_0, %c0_1] : memref<1x10x256xbf16, #tpu.memory_space<vmem>>, vector<1x10x256xbf16>
    %1 = vector.shape_cast %0 : vector<1x10x256xbf16> to vector<10x256xbf16>
    %2 = arith.extf %1 : vector<10x256xbf16> to vector<10x256xf32>
    %c0_2 = arith.constant 0 : index
    %c0_3 = arith.constant 0 : index
    %3 = vector.load %arg2[%c0_2, %c0_3] : memref<10x1xf32, #tpu.memory_space<vmem>>, vector<10x1xf32>
    %4 = vector.broadcast %3 : vector<10x1xf32> to vector<10x256xf32>
    %5 = arith.mulf %2, %4 : vector<10x256xf32>
    %c0_4 = arith.constant 0 : index
    %c0_5 = arith.constant 0 : index
    %6 = vector.load %arg3[%c0_4, %c0_5] : memref<10x1xf32, #tpu.memory_space<vmem>>, vector<10x1xf32>
    %7 = vector.broadcast %6 : vector<10x1xf32> to vector<10x256xf32>
    %8 = arith.addf %5, %7 : vector<10x256xf32>
    %cst = arith.constant 0.000000e+00 : f32
    %9 = vector.broadcast %cst : f32 to vector<10x256xf32>
    %10 = arith.maximumf %8, %9 : vector<10x256xf32>
    %cst_6 = arith.constant 0.000000e+00 : bf16
    %11 = vector.broadcast %cst_6 : bf16 to vector<10x64xbf16>
    %12 = arith.truncf %10 : vector<10x256xf32> to vector<10x256xbf16>
    %13 = tpu.concatenate %11, %12, %11 in 1 : vector<10x64xbf16>, vector<10x256xbf16>, vector<10x64xbf16> -> vector<10x384xbf16>
    %14 = vector.extract_strided_slice %13 {offsets = [0, 0], sizes = [10, 256], strides = [1, 1]} : vector<10x384xbf16> to vector<10x256xbf16>
    %15 = vector.extract_strided_slice %13 {offsets = [0, 16], sizes = [10, 256], strides = [1, 1]} : vector<10x384xbf16> to vector<10x256xbf16>
    %16 = vector.extract_strided_slice %13 {offsets = [0, 32], sizes = [10, 256], strides = [1, 1]} : vector<10x384xbf16> to vector<10x256xbf16>
    %17 = vector.extract_strided_slice %13 {offsets = [0, 48], sizes = [10, 256], strides = [1, 1]} : vector<10x384xbf16> to vector<10x256xbf16>
    %18 = vector.extract_strided_slice %13 {offsets = [0, 64], sizes = [10, 256], strides = [1, 1]} : vector<10x384xbf16> to vector<10x256xbf16>
    %19 = vector.extract_strided_slice %13 {offsets = [0, 80], sizes = [10, 256], strides = [1, 1]} : vector<10x384xbf16> to vector<10x256xbf16>
    %20 = vector.extract_strided_slice %13 {offsets = [0, 96], sizes = [10, 256], strides = [1, 1]} : vector<10x384xbf16> to vector<10x256xbf16>
    %21 = vector.extract_strided_slice %13 {offsets = [0, 112], sizes = [10, 256], strides = [1, 1]} : vector<10x384xbf16> to vector<10x256xbf16>
    %22 = vector.extract_strided_slice %13 {offsets = [0, 128], sizes = [10, 256], strides = [1, 1]} : vector<10x384xbf16> to vector<10x256xbf16>
    %23 = tpu.concatenate %14, %15, %16, %17, %18, %19, %20, %21, %22 in 0 : vector<10x256xbf16>, vector<10x256xbf16>, vector<10x256xbf16>, vector<10x256xbf16>, vector<10x256xbf16>, vector<10x256xbf16>, vector<10x256xbf16>, vector<10x256xbf16>, vector<10x256xbf16> -> vector<90x256xbf16>
    %c0_7 = arith.constant 0 : index
    %c0_8 = arith.constant 0 : index
    %24 = vector.load %arg4[%c0_7, %c0_8] : memref<8x90xbf16, #tpu.memory_space<vmem>>, vector<8x90xbf16>
    %cst_9 = arith.constant dense<0.000000e+00> : vector<8x256xf32>
    %25 = tpu.matmul %24, %23, %cst_9 {dimension_numbers = #tpu.dot_dimension_numbers<[1], [0], [0], [1], [0, 0, 1, 1], [], []>} : vector<8x90xbf16>, vector<90x256xbf16>, vector<8x256xf32> -> vector<8x256xf32>
    %26 = arith.maximumf %17, %18 : vector<10x256xbf16>
    %27 = arith.maximumf %26, %19 : vector<10x256xbf16>
    %28 = vector.extract_strided_slice %27 {offsets = [8, 0], sizes = [2, 256], strides = [1, 1]} : vector<10x256xbf16> to vector<2x256xbf16>
    %29 = arith.extf %28 : vector<2x256xbf16> to vector<2x256xf32>
    %30 = tpu.concatenate %25, %29 in 0 : vector<8x256xf32>, vector<2x256xf32> -> vector<10x256xf32>
    %31 = arith.truncf %30 : vector<10x256xf32> to vector<10x256xbf16>
    %c0_10 = arith.constant 0 : index
    %c0_11 = arith.constant 0 : index
    %c0_12 = arith.constant 0 : index
    %32 = vector.load %arg5[%c0_10, %c0_11, %c0_12] : memref<1x10x256xbf16, #tpu.memory_space<vmem>>, vector<1x10x256xbf16>
    %33 = vector.shape_cast %32 : vector<1x10x256xbf16> to vector<10x256xbf16>
    %34 = vector.shape_cast %31 : vector<10x256xbf16> to vector<1x10x256xbf16>
    tpu.vector_store %arg5[%c0_10, %c0_11, %c0_12], %34 {strides = array<i32>} : memref<1x10x256xbf16, #tpu.memory_space<vmem>>, vector<1x10x256xbf16>,
    %cst_13 = arith.constant dense<0.000000e+00> : vector<10xf32>
    %35 = vector.multi_reduction <add>, %30, %cst_13 [1] : vector<10x256xf32> to vector<10xf32>
    %36 = vector.shape_cast %35 : vector<10xf32> to vector<10x1xf32>
    %c0_14 = arith.constant 0 : index
    %c0_15 = arith.constant 0 : index
    %c0_16 = arith.constant 0 : index
    %37 = vector.load %arg6[%c0_14, %c0_15, %c0_16] : memref<1x10x1xf32, #tpu.memory_space<vmem>>, vector<1x10x1xf32>
    %38 = vector.shape_cast %37 : vector<1x10x1xf32> to vector<10x1xf32>
    %39 = vector.shape_cast %36 : vector<10x1xf32> to vector<1x10x1xf32>
    tpu.vector_store %arg6[%c0_14, %c0_15, %c0_16], %39 {strides = array<i32>} : memref<1x10x1xf32, #tpu.memory_space<vmem>>, vector<1x10x1xf32>,
    %40 = arith.mulf %30, %30 : vector<10x256xf32>
    %cst_17 = arith.constant dense<0.000000e+00> : vector<10xf32>
    %41 = vector.multi_reduction <add>, %40, %cst_17 [1] : vector<10x256xf32> to vector<10xf32>
    %42 = vector.shape_cast %41 : vector<10xf32> to vector<10x1xf32>
    %c0_18 = arith.constant 0 : index
    %c0_19 = arith.constant 0 : index
    %c0_20 = arith.constant 0 : index
    %43 = vector.load %arg7[%c0_18, %c0_19, %c0_20] : memref<1x10x1xf32, #tpu.memory_space<vmem>>, vector<1x10x1xf32>
    %44 = vector.shape_cast %43 : vector<1x10x1xf32> to vector<10x1xf32>
    %45 = vector.shape_cast %42 : vector<10x1xf32> to vector<1x10x1xf32>
    tpu.vector_store %arg7[%c0_18, %c0_19, %c0_20], %45 {strides = array<i32>} : memref<1x10x1xf32, #tpu.memory_space<vmem>>, vector<1x10x1xf32>,
    return
  }
  func.func @transform_0(%arg0: i32) -> (i32, i32, i32) {
    %c0_i32 = arith.constant 0 : i32
    %c0_i32_0 = arith.constant 0 : i32
    %c0_i32_1 = arith.constant 0 : i32
    return %arg0, %c0_i32, %c0_i32_0 : i32, i32, i32
  }
  func.func @transform_1(%arg0: i32) -> (i32, i32) {
    %c0_i32 = arith.constant 0 : i32
    %c0_i32_0 = arith.constant 0 : i32
    %c0_i32_1 = arith.constant 0 : i32
    return %c0_i32, %c0_i32_0 : i32, i32
  }
  func.func @transform_2(%arg0: i32) -> (i32, i32) {
    %c0_i32 = arith.constant 0 : i32
    %c0_i32_0 = arith.constant 0 : i32
    %c0_i32_1 = arith.constant 0 : i32
    return %c0_i32, %c0_i32_0 : i32, i32
  }
  func.func @transform_3(%arg0: i32) -> (i32, i32) {
    %c0_i32 = arith.constant 0 : i32
    %c0_i32_0 = arith.constant 0 : i32
    %c0_i32_1 = arith.constant 0 : i32
    return %c0_i32, %c0_i32_0 : i32, i32
  }
  func.func @transform_4(%arg0: i32) -> (i32, i32, i32) {
    %c0_i32 = arith.constant 0 : i32
    %c0_i32_0 = arith.constant 0 : i32
    %c0_i32_1 = arith.constant 0 : i32
    return %arg0, %c0_i32, %c0_i32_0 : i32, i32, i32
  }
  func.func @transform_5(%arg0: i32) -> (i32, i32, i32) {
    %c0_i32 = arith.constant 0 : i32
    %c0_i32_0 = arith.constant 0 : i32
    %c0_i32_1 = arith.constant 0 : i32
    return %arg0, %c0_i32, %c0_i32_0 : i32, i32, i32
  }
  func.func @transform_6(%arg0: i32) -> (i32, i32, i32) {
    %c0_i32 = arith.constant 0 : i32
    %c0_i32_0 = arith.constant 0 : i32
    %c0_i32_1 = arith.constant 0 : i32
    return %arg0, %c0_i32, %c0_i32_0 : i32, i32, i32
  }
}

module attributes {stable_mosaic.version = 11 : i64} {
  func.func @_final_fuse_kernel(%arg0: i32, %arg1: memref<1x10x256xbf16, #tpu.memory_space<vmem>>, %arg2: memref<1x14x256xbf16, #tpu.memory_space<vmem>>, %arg3: memref<10x1xf32, #tpu.memory_space<vmem>>, %arg4: memref<10x1xf32, #tpu.memory_space<vmem>>, %arg5: memref<14x1xf32, #tpu.memory_space<vmem>>, %arg6: memref<14x1xf32, #tpu.memory_space<vmem>>, %arg7: memref<1x12x256xf32, #tpu.memory_space<vmem>>) attributes {dimension_semantics = [#tpu.dimension_semantics<parallel>], iteration_bounds = array<i64: 2>, scalar_prefetch = 0 : i64, scratch_operands = 0 : i64, tpu.core_type = #tpu.core_type<tc>, window_params = [{transform_indices = @transform_0, window_bounds = array<i64: 1, 10, 256>}, {transform_indices = @transform_1, window_bounds = array<i64: 1, 14, 256>}, {pipeline_mode = #tpu.pipeline_mode<synchronous>, transform_indices = @transform_2, window_bounds = array<i64: 10, 1>}, {pipeline_mode = #tpu.pipeline_mode<synchronous>, transform_indices = @transform_3, window_bounds = array<i64: 10, 1>}, {pipeline_mode = #tpu.pipeline_mode<synchronous>, transform_indices = @transform_4, window_bounds = array<i64: 14, 1>}, {pipeline_mode = #tpu.pipeline_mode<synchronous>, transform_indices = @transform_5, window_bounds = array<i64: 14, 1>}, {transform_indices = @transform_6, window_bounds = array<i64: 1, 12, 256>}]} {
    %c0 = arith.constant 0 : index
    %c0_0 = arith.constant 0 : index
    %c0_1 = arith.constant 0 : index
    %0 = vector.load %arg1[%c0, %c0_0, %c0_1] : memref<1x10x256xbf16, #tpu.memory_space<vmem>>, vector<1x10x256xbf16>
    %1 = vector.shape_cast %0 : vector<1x10x256xbf16> to vector<10x256xbf16>
    %2 = arith.extf %1 : vector<10x256xbf16> to vector<10x256xf32>
    %c0_2 = arith.constant 0 : index
    %c0_3 = arith.constant 0 : index
    %3 = vector.load %arg3[%c0_2, %c0_3] : memref<10x1xf32, #tpu.memory_space<vmem>>, vector<10x1xf32>
    %4 = vector.broadcast %3 : vector<10x1xf32> to vector<10x256xf32>
    %5 = arith.mulf %2, %4 : vector<10x256xf32>
    %c0_4 = arith.constant 0 : index
    %c0_5 = arith.constant 0 : index
    %6 = vector.load %arg4[%c0_4, %c0_5] : memref<10x1xf32, #tpu.memory_space<vmem>>, vector<10x1xf32>
    %7 = vector.broadcast %6 : vector<10x1xf32> to vector<10x256xf32>
    %8 = arith.addf %5, %7 : vector<10x256xf32>
    %c0_6 = arith.constant 0 : index
    %c0_7 = arith.constant 0 : index
    %c0_8 = arith.constant 0 : index
    %9 = vector.load %arg2[%c0_6, %c0_7, %c0_8] : memref<1x14x256xbf16, #tpu.memory_space<vmem>>, vector<1x14x256xbf16>
    %10 = vector.shape_cast %9 : vector<1x14x256xbf16> to vector<14x256xbf16>
    %11 = arith.extf %10 : vector<14x256xbf16> to vector<14x256xf32>
    %c0_9 = arith.constant 0 : index
    %c0_10 = arith.constant 0 : index
    %12 = vector.load %arg5[%c0_9, %c0_10] : memref<14x1xf32, #tpu.memory_space<vmem>>, vector<14x1xf32>
    %13 = vector.broadcast %12 : vector<14x1xf32> to vector<14x256xf32>
    %14 = arith.mulf %11, %13 : vector<14x256xf32>
    %c0_11 = arith.constant 0 : index
    %c0_12 = arith.constant 0 : index
    %15 = vector.load %arg6[%c0_11, %c0_12] : memref<14x1xf32, #tpu.memory_space<vmem>>, vector<14x1xf32>
    %16 = vector.broadcast %15 : vector<14x1xf32> to vector<14x256xf32>
    %17 = arith.addf %14, %16 : vector<14x256xf32>
    %18 = vector.extract_strided_slice %17 {offsets = [0, 0], sizes = [2, 256], strides = [1, 1]} : vector<14x256xf32> to vector<2x256xf32>
    %19 = tpu.concatenate %8, %18 in 0 : vector<10x256xf32>, vector<2x256xf32> -> vector<12x256xf32>
    %20 = vector.extract_strided_slice %17 {offsets = [2, 0], sizes = [12, 256], strides = [1, 1]} : vector<14x256xf32> to vector<12x256xf32>
    %21 = arith.addf %19, %20 : vector<12x256xf32>
    %c0_13 = arith.constant 0 : index
    %c0_14 = arith.constant 0 : index
    %c0_15 = arith.constant 0 : index
    %22 = vector.load %arg7[%c0_13, %c0_14, %c0_15] : memref<1x12x256xf32, #tpu.memory_space<vmem>>, vector<1x12x256xf32>
    %23 = vector.shape_cast %22 : vector<1x12x256xf32> to vector<12x256xf32>
    %24 = vector.shape_cast %21 : vector<12x256xf32> to vector<1x12x256xf32>
    tpu.vector_store %arg7[%c0_13, %c0_14, %c0_15], %24 {strides = array<i32>} : memref<1x12x256xf32, #tpu.memory_space<vmem>>, vector<1x12x256xf32>,
    return
  }
  func.func @transform_0(%arg0: i32) -> (i32, i32, i32) {
    %c0_i32 = arith.constant 0 : i32
    %c0_i32_0 = arith.constant 0 : i32
    %c0_i32_1 = arith.constant 0 : i32
    return %arg0, %c0_i32, %c0_i32_0 : i32, i32, i32
  }
  func.func @transform_1(%arg0: i32) -> (i32, i32, i32) {
    %c0_i32 = arith.constant 0 : i32
    %c0_i32_0 = arith.constant 0 : i32
    %c0_i32_1 = arith.constant 0 : i32
    return %arg0, %c0_i32, %c0_i32_0 : i32, i32, i32
  }
  func.func @transform_2(%arg0: i32) -> (i32, i32) {
    %c0_i32 = arith.constant 0 : i32
    %c0_i32_0 = arith.constant 0 : i32
    %c0_i32_1 = arith.constant 0 : i32
    return %c0_i32, %c0_i32_0 : i32, i32
  }
  func.func @transform_3(%arg0: i32) -> (i32, i32) {
    %c0_i32 = arith.constant 0 : i32
    %c0_i32_0 = arith.constant 0 : i32
    %c0_i32_1 = arith.constant 0 : i32
    return %c0_i32, %c0_i32_0 : i32, i32
  }
  func.func @transform_4(%arg0: i32) -> (i32, i32) {
    %c0_i32 = arith.constant 0 : i32
    %c0_i32_0 = arith.constant 0 : i32
    %c0_i32_1 = arith.constant 0 : i32
    return %c0_i32, %c0_i32_0 : i32, i32
  }
  func.func @transform_5(%arg0: i32) -> (i32, i32) {
    %c0_i32 = arith.constant 0 : i32
    %c0_i32_0 = arith.constant 0 : i32
    %c0_i32_1 = arith.constant 0 : i32
    return %c0_i32, %c0_i32_0 : i32, i32
  }
  func.func @transform_6(%arg0: i32) -> (i32, i32, i32) {
    %c0_i32 = arith.constant 0 : i32
    %c0_i32_0 = arith.constant 0 : i32
    %c0_i32_1 = arith.constant 0 : i32
    return %arg0, %c0_i32, %c0_i32_0 : i32, i32, i32
  }
}

</mosaic_0001>

<bundles_post_ra>
// kernel: _lambda_.3
= control target key start
LH: loop header
LB: loop body
LE: loop exit
PB: predicated region body
PF: predicated region fallthrough
CT: control target
= control target key end

     0   :  { %s800_s18 = smov 0   ;;  %s802_s19 = smov 0   ;;  %s857_s0 = inlined_call_operand.vmem [shape: f32[2,8,256], index: 0, kind: input, shape index: {}]   ;;  %s858_s1 = inlined_call_operand.vmem [shape: bf16[24,8], index: 1, kind: input, shape index: {}]   ;;  %s859_s2 = inlined_call_operand.vmem [shape: bf16[2,10,256], index: 2, kind: output, shape index: {0}]   ;;  %s860_s3 = inlined_call_operand.vmem [shape: bf16[2,14,256], index: 3, kind: output, shape index: {1}]   ;;  %s861_s4 = inlined_call_operand.vmem [shape: f32[2,1,24,1], index: 4, kind: output, shape index: {2}]   ;;  %s862_s5 = inlined_call_operand.vmem [shape: f32[2,1,24,1], index: 5, kind: output, shape index: {3}]  }
   0x1   :  { %s804_s20 = smov 0  }
   0x2 LB: > { %s28_s21 = sadd.s32 1, %s764_s19  ;;  %p695_p0 = scmp.ge.s32.totalorder %s768_s20, 1  ;;  %s768_s20 = sphi %s804_s20, %s16_s20   ;;  %s764_s19 = sphi %s802_s19, %s864_s19   ;;  %s760_s18 = sphi %s800_s18, %s863_s18  }
   0x3   : > { %p30_p1 = scmp.ge.s32.totalorder %s28_s21, 2  ;;  %p221_p2 = scmp.lt.s32.totalorder %s768_s20, 3 }
   0x5   : > { %s866_s21 = smov (%p30_p1, %s28_s21), 0  ;;  %p222_p3 = pnand %p695_p0, %p221_p2 }
   0x6   : > { %p285_p4 = scmp.lt.s32.totalorder (!%p222_p3), %s760_s18, 1 }
   0x7   : > { %225 = sbr.rel (%p222_p3) target bundleno = 286 (0x11e), region = 28 }
   0xc   : > { %s868_s18 = smov (!%p285_p4, %s760_s18), 1  ;;  %v339_v0 = vld [vmem:[%s858_s1 + $0x8] sm:$0xf]  ;;  %vm355_vm0 = vcmask 1043456   ;;  %v718_v8 = vld [vmem:[%s858_s1] sm:$0xff]  ;;  %vm348_vm1 = vcmask 64512  }
   0xd   : > { %s824_s24 = sshll.u32 %s868_s18, 4  ;;  %v345_v1 = vunpack.c.l.b16 %v339_v0  ;;  %vm405_vm2 = vcmask 1042432   ;;  %vm406_vm3 = vcmask 1046532   ;;  %s721_s11 = smul.u32 24, %s868_s18  ;;  %vm426_vm5 = vcmask 7168  }
   0xe   : > { %s292_s27 = scalar_lea.vmem %s857_s0, %s824_s24  ;;  %s302_s7 = scalar_lea.vmem %s859_s2, %s824_s24  ;;  %vm407_vm4 = vmor %vm405_vm2, %vm406_vm3 }
   0xf   : > { %v333_v2 = vld [vmem:[%s292_s27] sm:$0xff]  ;;  %v334_v3 = vld [vmem:[%s292_s27 + $0x8] sm:$0xff]  ;;  %v347_v9 = vpack.c.b16 %v345_v1, %v345_v1  ;;  %s312_s10 = scalar_lea.vmem %s860_s3, %s824_s24  ;;  %s322_s14 = scalar_lea.vmem %s861_s4, %s721_s11 }
  0x10   : > { %v335_v4 = vpack.c.bf16 %v333_v2, %v333_v2  ;;  %v336_v5 = vpack.c.bf16 %v334_v3, %v334_v3  ;;  %s331_s17 = scalar_lea.vmem %s862_s5, %s721_s11 }
  0x12   : > { %v357_v6 = vsel %vm355_vm0, %v335_v4, 0  ;;  %v360_v7 = vsel %vm355_vm0, %v336_v5, 0 }
  0x13   : > { %369 = vmatpush.bf16.msra.mxu0 %v357_v6  ;;  %719 = vmatpush.bf16.msra.mxu2 %v357_v6 }
  0x14   : > { %387 = vmatpush.bf16.msra.mxu1 %v360_v7  ;;  %720 = vmatpush.bf16.msra.mxu3 %v360_v7 }
  0x16   : > { %708 = vmatmul.msk.bf16.vlgmr.msra.gmra.mxu0 %vm348_vm1, %v718_v8  ;;  %709 = vmatmul.msk.bf16.vlgmr.msra.gmra.mxu2 %vm348_vm1, %v347_v9 }
  0x17   : > { %710 = vmatmul.msk.bf16.vlgmr.msra.gmra.mxu1 %vm348_vm1, %v718_v8  ;;  %711 = vmatmul.msk.bf16.vlgmr.msra.gmra.mxu3 %vm348_vm1, %v347_v9 }
  0x93   : > { %v371_v10 = vpop.f32.mrf.mxu0 }
  0x94   : > { %v389_v11 = vpop.f32.mrf.mxu1  ;;  %v430_v25 = vmul.f32 %v371_v10, %v371_v10 }
  0x95   : > { %v398_v12 = vpack.c.bf16 %v389_v11, %v371_v10  ;;  %v417_v13 = vadd.f32 %v389_v11, %v371_v10  ;;  %v431_v29 = vmul.f32 %v389_v11, %v389_v11 }
  0x97   : > { %418 = vadd.xlane.f32.xlu0 %v417_v13  ;;  %400 = vst [vmem:[%s302_s7] sm:$0xff] %v398_v12  ;;  %v436_v33 = vadd.f32 %v431_v29, %v430_v25 }
  0x99   : > { %v376_v14 = vpop.f32.mrf.mxu2 }
  0x9a   : > { %v394_v15 = vpop.f32.mrf.mxu3  ;;  %v434_v34 = vmul.f32 %v376_v14, %v376_v14 }
  0x9b   : > { %v402_v16 = vpack.c.bf16 %v394_v15, %v376_v14  ;;  %v373_v17 = vpop.f32.mrf.mxu0  ;;  %v423_v18 = vadd.f32 %v394_v15, %v376_v14  ;;  %v435_v35 = vmul.f32 %v394_v15, %v394_v15 }
  0x9c   : > { %v432_v19 = vmul.f32 %v373_v17, %v373_v17  ;;  %v391_v20 = vpop.f32.mrf.mxu1 }
  0x9d   : > { %v410_v21 = vrot.slane %v402_v16, 5  ;;  %v399_v22 = vpack.c.bf16 %v391_v20, %v373_v17  ;;  %v433_v23 = vmul.f32 %v391_v20, %v391_v20  ;;  %424 = vadd.xlane.f32.xlu1 %v423_v18  ;;  %v420_v24 = vadd.f32 %v391_v20, %v373_v17 }
  0x9e   : > { %v442_v36 = vadd.f32 %v435_v35, %v434_v34 }
  0x9f   : > { %v412_v26 = vrot.slane %v410_v21, 4  ;;  %401 = vst [vmem:[%s302_s7 + $0x8] sm:$0x11] %v399_v22  ;;  %v712_v27 = vrot.slane %v399_v22, 9  ;;  %421 = vadd.xlane.f32.xlu0 %v420_v24  ;;  %v439_v28 = vadd.f32 %v433_v23, %v432_v19 }
  0xa1   : > { %416 = vst [vmem:[%s312_s10 + $0x8] sm:$0x77] %v412_v26  ;;  %v411_v30 = vsel %vm407_vm4, %v712_v27, %v410_v21  ;;  %440 = vadd.xlane.f32.xlu2 %v439_v28  ;;  %v378_v31 = vpop.f32.mrf.mxu2 }
  0xa2   : > { %415 = vst [vmem:[%s312_s10] sm:$0xff] %v411_v30  ;;  %v396_v32 = vpop.f32.mrf.mxu3 }
  0xa5   : > { %437 = vadd.xlane.f32.xlu1 %v436_v33 }
  0xa9   : > { %443 = vadd.xlane.f32.xlu2 %v442_v36 }
 0x10a   : > { %v419_v37 = vpop.xlane.xlu0 %418 }
 0x10b   : > { %427 = vst.msk [vmem:[%s322_s14] sm:$0xff] %vm426_vm5, %v419_v37 }
 0x110   : > { %v425_v38 = vpop.xlane.xlu1 %424 }
 0x111   : > { %429 = vst.msk [vmem:[%s322_s14 + $0x10] sm:$0xff] %vm426_vm5, %v425_v38 }
 0x112   : > { %v422_v39 = vpop.xlane.xlu0 %421 }
 0x113   : > { %428 = vst.msk [vmem:[%s322_s14 + $0x8] sm:$0xff] %vm426_vm5, %v422_v39 }
 0x114   : > { %v441_v40 = vpop.xlane.xlu2 %440 }
 0x115   : > { %446 = vst.msk [vmem:[%s331_s17 + $0x8] sm:$0xff] %vm426_vm5, %v441_v40 }
 0x118   : > { %v438_v41 = vpop.xlane.xlu1 %437 }
 0x119   : > { %445 = vst.msk [vmem:[%s331_s17] sm:$0xff] %vm426_vm5, %v438_v41 }
 0x11c   : > { %v444_v42 = vpop.xlane.xlu2 %443 }
 0x11d   : > { %447 = vst.msk [vmem:[%s331_s17 + $0x10] sm:$0xff] %vm426_vm5, %v444_v42 }
 0x11e PF: > { %s16_s20 = sadd.s32 1, %s768_s20   ;;  %s863_s18 = smov %s764_s19 }
 0x11f   : > { %p13_p5 = scmp.ge.s32.totalorder %s16_s20, 4   ;;  %s864_s19 = smov %s866_s21 }
 0x121   :  { %15 = sbr.rel (!%p13_p5) target bundleno = 2 (0x2), region = 94 }

// kernel: _lambda_.4
= control target key start
LH: loop header
LB: loop body
LE: loop exit
PB: predicated region body
PF: predicated region fallthrough
CT: control target
= control target key end

     0   :  { %s827_s21 = smov 0   ;;  %s944_s0 = inlined_call_operand.vmem [shape: bf16[2,10,256], index: 0, kind: input, shape index: {}]   ;;  %s945_s1 = inlined_call_operand.vmem [shape: f32[10,1], index: 1, kind: input, shape index: {}]   ;;  %s946_s2 = inlined_call_operand.vmem [shape: f32[10,1], index: 2, kind: input, shape index: {}]   ;;  %s947_s3 = inlined_call_operand.vmem [shape: bf16[8,90], index: 3, kind: input, shape index: {}]   ;;  %s948_s4 = inlined_call_operand.vmem [shape: bf16[2,10,256], index: 4, kind: output, shape index: {0}]   ;;  %s949_s5 = inlined_call_operand.vmem [shape: f32[2,10,1], index: 5, kind: output, shape index: {1}]   ;;  %s950_s6 = inlined_call_operand.vmem [shape: f32[2,10,1], index: 6, kind: output, shape index: {2}]  }
   0x1 LB: > { %s722_s22 = sadd.s32 4294967295, %s782_s21   ;;  %p726_p0 = scmp.ge.s32.totalorder %s782_s21, 1  ;;  %s782_s21 = sphi %s827_s21, %s17_s21  }
   0x2   : > { %p217_p1 = scmp.lt.s32.totalorder %s782_s21, 3 }
   0x4   : > { %p218_p2 = pnand %p726_p0, %p217_p1 }
   0x5   : > { %p257_p3 = scmp.lt.s32.totalorder (!%p218_p2), %s722_s22, 1  ;;  %s785_s11 = smov (!%p218_p2), 64  }
   0x6   : > { %221 = sbr.rel (%p218_p2) target bundleno = 679 (0x2a7), region = 36  ;;  %s786_s12 = smov (!%p218_p2), 32  }
   0x7   : > { %s787_s13 = smov (!%p218_p2), 16   ;;  %s788_s14 = smov (!%p218_p2), 48  }
   0x8   : > { %s789_s15 = smov (!%p218_p2), 80   ;;  %s790_s16 = smov (!%p218_p2), 112  }
   0x9   : > { %s791_s17 = smov (!%p218_p2), 96  }
   0xb   : > { %v300_v0 = vld [vmem:[%s946_s2] sm:$0xff]  ;;  %v784_v2 = vmov 0   ;;  %v301_v3 = vld [vmem:[%s946_s2 + $0x8] sm:$0x3]  ;;  %s952_s22 = smov (!%p257_p3, %s722_s22), 1  ;;  %vm334_vm0 = vcmask 523264  }
   0xc   : > { %v284_v1 = vld [vmem:[%s945_s1] sm:$0xff]  ;;  %760 = vset.pattern.permute.xlu1 %v784_v2  ;;  %759 = vset.pattern.permute.xlu0 %v784_v2  ;;  %v285_v4 = vld [vmem:[%s945_s1 + $0x8] sm:$0x3]  ;;  %s847_s7 = sshll.u32 %s952_s22, 4  ;;  %vm430_vm1 = vcmask 1044480   ;;  %vm415_vm2 = vcmask 261120  }
   0xd   : > { %304 = vperm.xlu1 %760, %v300_v0   ;;  %288 = vperm.xlu0 %759, %v284_v1   ;;  %s261_s10 = scalar_lea.vmem %s944_s0, %s847_s7  ;;  %vm427_vm3 = vcmask 130048   ;;  %vm469_vm4 = vcmask 1042432   ;;  %vm403_vm5 = vcmask 392192   ;;  %vm457_vm6 = vcmask 1040384   ;;  %s266_s23 = scalar_lea.vmem %s948_s4, %s847_s7 }
   0xe   : > { %v278_v5 = vld [vmem:[%s261_s10] sm:$0xff]  ;;  %v279_v12 = vld [vmem:[%s261_s10 + $0x8] sm:$0x11]  ;;  %vm462_vm7 = vcmask 1045504   ;;  %vm380_vm8 = vcmask 654336   ;;  %vm450_vm9 = vcmask 1043456   ;;  %s271_s26 = scalar_lea.vmem %s949_s5, %s847_s7  ;;  %s276_s29 = scalar_lea.vmem %s950_s6, %s847_s7 }
   0xf   : > { %v280_v6 = vunpack.c.l.bf16 %v278_v5  ;;  %v281_v7 = vunpack.c.h.bf16 %v278_v5  ;;  %v282_v15 = vunpack.c.l.bf16 %v279_v12  ;;  %v283_v16 = vunpack.c.h.bf16 %v279_v12 }
  0x10   : > { %vm356_vm10 = vcmask 916480   ;;  %vm438_vm11 = vcmask 1041408   ;;  %vm368_vm12 = vcmask 785408   ;;  %vm443_vm13 = vcmask 1046528  }
  0x11   : > { %vm477_vm14 = vcmask 736256   ;;  %vm583_vm15 = vcmask 7168  }
  0x15   : > { %309 = vperm.xlu1 %760, %v301_v3   ;;  %293 = vperm.xlu0 %759, %v285_v4  }
  0x7f   : > { %v305_v8 = vpop.permute.xlu1 %304  ;;  %v289_v9 = vpop.permute.xlu0 %288 }
  0x80   : > { %v296_v10 = vmul.f32 %v289_v9, %v280_v6  ;;  %v297_v11 = vmul.f32 %v289_v9, %v281_v7 }
  0x82   : > { %v312_v13 = vadd.f32 %v305_v8, %v296_v10  ;;  %v313_v14 = vadd.f32 %v305_v8, %v297_v11 }
  0x84   : > { %v316_v18 = vmax.f32 %v312_v13, 0.0  ;;  %v317_v19 = vmax.f32 %v313_v14, 0.0 }
  0x86   : > { %v320_v27 = vpack.c.bf16 %v317_v19, %v316_v18 }
  0x87   : > { %v294_v17 = vpop.permute.xlu0 %293  ;;  %v310_v22 = vpop.permute.xlu1 %309 }
  0x88   : > { %v298_v20 = vmul.f32 %v294_v17, %v282_v15  ;;  %v299_v21 = vmul.f32 %v294_v17, %v283_v16  ;;  %v324_v29 = vunpack.c.l.b16 %v320_v27  ;;  %v325_v33 = vunpack.c.h.b16 %v320_v27 }
  0x8a   : > { %v314_v23 = vadd.f32 %v310_v22, %v298_v20  ;;  %v315_v24 = vadd.f32 %v310_v22, %v299_v21 }
  0x8c   : > { %v318_v25 = vmax.f32 %v314_v23, 0.0  ;;  %v319_v26 = vmax.f32 %v315_v24, 0.0 }
  0x8e   : > { %v321_v28 = vpack.c.bf16 %v319_v26, %v318_v25 }
  0x90   : > { %v326_v30 = vunpack.c.l.b16 %v321_v28  ;;  %v327_v32 = vunpack.c.h.b16 %v321_v28 }
  0x92   : > { %v328_v31 = vpack.c.b16 %v326_v30, %v324_v29  ;;  %v329_v34 = vpack.c.b16 %v327_v32, %v325_v33 }
  0x94   : > { %330 = vrot.lane.b32.xlu2 %v328_v31, %s785_s11 }
  0x9c   : > { %332 = vrot.lane.b32.xlu2 %v329_v34, %s785_s11 }
  0xee   : > { %v331_v35 = vpop.permute.xlu2 %330 }
  0xef   : > { %v856_v36 = vsel %vm334_vm0, 0, %v331_v35 }
  0xf0   : > { %v406_v37 = vrot.slane %v856_v36, 2  ;;  %v418_v41 = vrot.slane %v856_v36, 5  ;;  %v383_v46 = vrot.slane %v856_v36, 4  ;;  %v394_v49 = vrot.slane %v856_v36, 7 }
  0xf1   : > { %v371_v52 = vrot.slane %v856_v36, 1  ;;  %v347_v55 = vrot.slane %v856_v36, 3  ;;  %v359_v58 = vrot.slane %v856_v36, 6  ;;  %v511_v62 = vunpack.c.h.bf16 %v856_v36 }
  0xf2   : > { %409 = vrot.lane.b32.xlu0 %v406_v37, %s786_s12 }
  0xf6   : > { %v333_v38 = vpop.permute.xlu2 %332 }
  0xf7   : > { %v860_v39 = vsel %vm334_vm0, %v331_v35, %v333_v38  ;;  %v343_v40 = vsel %vm334_vm0, %v333_v38, 0 }
  0xf8   : > { %v481_v42 = vsel %vm430_vm1, %v860_v39, 0  ;;  %v483_v43 = vsel %vm430_vm1, %v343_v40, 0  ;;  %v408_v44 = vrot.slane %v343_v40, 2  ;;  %v407_v45 = vrot.slane %v860_v39, 2 }
  0xf9   : > { %487 = vmatpush.bf16.msra.mxu0 %v481_v42  ;;  %500 = vmatpush.bf16.msra.mxu1 %v483_v43  ;;  %v420_v47 = vrot.slane %v343_v40, 5  ;;  %v419_v48 = vrot.slane %v860_v39, 5  ;;  %v385_v50 = vrot.slane %v343_v40, 4  ;;  %v384_v51 = vrot.slane %v860_v39, 4 }
  0xfa   : > { %421 = vrot.lane.b32.xlu0 %v418_v41, %s787_s13  ;;  %413 = vrot.lane.b32.xlu2 %v408_v44, %s786_s12  ;;  %v396_v53 = vrot.slane %v343_v40, 7  ;;  %v395_v54 = vrot.slane %v860_v39, 7  ;;  %v373_v56 = vrot.slane %v343_v40, 1  ;;  %v372_v57 = vrot.slane %v860_v39, 1 }
  0xfb   : > { %411 = vrot.lane.b32.xlu1 %v407_v45, %s786_s12  ;;  %v349_v59 = vrot.slane %v343_v40, 3  ;;  %v348_v60 = vrot.slane %v860_v39, 3  ;;  %v512_v61 = vunpack.c.h.bf16 %v860_v39  ;;  %v361_v63 = vrot.slane %v343_v40, 6 }
  0xfc   : > { %v360_v1 = vrot.slane %v860_v39, 6  ;;  %v891_v2 = vunpack.c.h.bf16 %v343_v40 }
  0xfd   : > { %v761_v0 = vpack.i.bf16 %v512_v61, %v511_v62 }
 0x102   : > { %386 = vrot.lane.b32.xlu0 %v383_v46, %s785_s11  ;;  %425 = vrot.lane.b32.xlu2 %v420_v47, %s787_s13 }
 0x103   : > { %423 = vrot.lane.b32.xlu1 %v419_v48, %s787_s13 }
 0x10a   : > { %397 = vrot.lane.b32.xlu0 %v394_v49, %s788_s14  ;;  %390 = vrot.lane.b32.xlu2 %v385_v50, %s785_s11 }
 0x10b   : > { %388 = vrot.lane.b32.xlu1 %v384_v51, %s785_s11 }
 0x112   : > { %374 = vrot.lane.b32.xlu0 %v371_v52, %s789_s15  ;;  %401 = vrot.lane.b32.xlu2 %v396_v53, %s788_s14 }
 0x113   : > { %399 = vrot.lane.b32.xlu1 %v395_v54, %s788_s14 }
 0x11a   : > { %350 = vrot.lane.b32.xlu0 %v347_v55, %s790_s16  ;;  %378 = vrot.lane.b32.xlu2 %v373_v56, %s789_s15 }
 0x11b   : > { %376 = vrot.lane.b32.xlu1 %v372_v57, %s789_s15 }
 0x122   : > { %362 = vrot.lane.b32.xlu0 %v359_v58, %s791_s17  ;;  %354 = vrot.lane.b32.xlu2 %v349_v59, %s790_s16 }
 0x123   : > { %352 = vrot.lane.b32.xlu1 %v348_v60, %s790_s16 }
 0x12a   : > { %366 = vrot.lane.b32.xlu2 %v361_v63, %s791_s17  ;;  %762 = vrot.lane.b32.xlu0 %v761_v0, %s790_s16 }
 0x12b   : > { %364 = vrot.lane.b32.xlu1 %v360_v1, %s791_s17 }
 0x132   : > { %767 = vrot.lane.b32.xlu2 %v761_v0, %s791_s17  ;;  %541 = vrot.lane.b32.xlu0 %v891_v2, %s791_s17 }
 0x133   : > { %521 = vrot.lane.b32.xlu1 %v891_v2, %s790_s16 }
 0x154   : > { %v414_v3 = vpop.permute.xlu2 %413 }
 0x15c   : > { %v426_v5 = vpop.permute.xlu2 %425 }
 0x164   : > { %v410_v4 = vpop.permute.xlu0 %409  ;;  %v391_v8 = vpop.permute.xlu2 %390 }
 0x16c   : > { %v422_v6 = vpop.permute.xlu0 %421  ;;  %v402_v17 = vpop.permute.xlu2 %401 }
 0x16d   : > { %v412_v7 = vpop.permute.xlu1 %411 }
 0x16e   : > { %v416_v11 = vsel %vm415_vm2, %v410_v4, %v412_v7  ;;  %v417_v12 = vsel %vm415_vm2, %v412_v7, %v414_v3  ;;  %v476_v3 = vld [vmem:[%s947_s3] sm:$0xf] }
 0x174   : > { %v387_v9 = vpop.permute.xlu0 %386  ;;  %v379_v20 = vpop.permute.xlu2 %378 }
 0x175   : > { %v424_v10 = vpop.permute.xlu1 %423 }
 0x176   : > { %v428_v13 = vsel %vm427_vm3, %v422_v6, %v424_v10  ;;  %v429_v14 = vsel %vm427_vm3, %v424_v10, %v426_v5 }
 0x177   : > { %v471_v15 = vsel %vm469_vm4, %v416_v11, %v428_v13  ;;  %v474_v16 = vsel %vm469_vm4, %v417_v12, %v429_v14 }
 0x178   : > { %488 = vmatpush.bf16.msra.mxu0 %v471_v15  ;;  %501 = vmatpush.bf16.msra.mxu1 %v474_v16 }
 0x17c   : > { %v398_v18 = vpop.permute.xlu0 %397  ;;  %v355_v32 = vpop.permute.xlu2 %354 }
 0x17d   : > { %v389_v19 = vpop.permute.xlu1 %388 }
 0x17e   : > { %v392_v23 = vsel %vm334_vm0, %v387_v9, %v389_v19  ;;  %v393_v24 = vsel %vm334_vm0, %v389_v19, %v391_v8  ;;  %vm585_vm0 = vcmask 1024  }
 0x184   : > { %v375_v21 = vpop.permute.xlu0 %374  ;;  %v367_v42 = vpop.permute.xlu2 %366 }
 0x185   : > { %v400_v22 = vpop.permute.xlu1 %399 }
 0x186   : > { %v404_v25 = vsel %vm403_vm5, %v398_v18, %v400_v22  ;;  %v405_v26 = vsel %vm403_vm5, %v400_v22, %v402_v17 }
 0x187   : > { %v459_v27 = vsel %vm457_vm6, %v392_v23, %v404_v25  ;;  %v461_v28 = vsel %vm457_vm6, %v393_v24, %v405_v26 }
 0x188   : > { %v464_v29 = vsel %vm462_vm7, %v459_v27, %v416_v11  ;;  %v467_v30 = vsel %vm462_vm7, %v461_v28, %v417_v12 }
 0x189   : > { %489 = vmatpush.bf16.msra.mxu0 %v464_v29  ;;  %502 = vmatpush.bf16.msra.mxu1 %v467_v30 }
 0x18c   : > { %v351_v31 = vpop.permute.xlu0 %350  ;;  %v768_v55 = vpop.permute.xlu2 %767 }
 0x18d   : > { %v377_v33 = vpop.permute.xlu1 %376  ;;  %v770_v57 = vunpack.i.h.bf16 %v768_v55  ;;  %v769_v58 = vunpack.i.l.bf16 %v768_v55 }
 0x18e   : > { %v381_v34 = vsel %vm380_vm8, %v375_v21, %v377_v33  ;;  %v382_v35 = vsel %vm380_vm8, %v377_v33, %v379_v20 }
 0x18f   : > { %v452_v37 = vsel %vm450_vm9, %v381_v34, %v392_v23  ;;  %v455_v38 = vsel %vm450_vm9, %v382_v35, %v393_v24  ;;  %v544_v7 = vsel %vm368_vm12, %v769_v58, %v770_v57 }
 0x190   : > { %490 = vmatpush.bf16.msra.mxu0 %v452_v37  ;;  %503 = vmatpush.bf16.msra.mxu1 %v455_v38 }
 0x194   : > { %v363_v40 = vpop.permute.xlu0 %362 }
 0x195   : > { %v353_v41 = vpop.permute.xlu1 %352 }
 0x196   : > { %v357_v44 = vsel %vm356_vm10, %v351_v31, %v353_v41  ;;  %v358_v45 = vsel %vm356_vm10, %v353_v41, %v355_v32 }
 0x197   : > { %v432_v59 = vsel %vm430_vm1, %v856_v36, %v357_v44  ;;  %v436_v60 = vsel %vm430_vm1, %v860_v39, %v358_v45 }
 0x19c   : > { %v763_v43 = vpop.permute.xlu0 %762 }
 0x19d   : > { %v365_v46 = vpop.permute.xlu1 %364  ;;  %v765_v47 = vunpack.i.h.bf16 %v763_v43  ;;  %v764_v48 = vunpack.i.l.bf16 %v763_v43 }
 0x19e   : > { %v369_v49 = vsel %vm368_vm12, %v363_v40, %v365_v46  ;;  %v370_v50 = vsel %vm368_vm12, %v365_v46, %v367_v42 }
 0x19f   : > { %v440_v51 = vsel %vm438_vm11, %v357_v44, %v369_v49  ;;  %v442_v52 = vsel %vm438_vm11, %v358_v45, %v370_v50  ;;  %v524_v56 = vsel %vm356_vm10, %v764_v48, %v765_v47 }
 0x1a0   : > { %v445_v53 = vsel %vm443_vm13, %v440_v51, %v381_v34  ;;  %v448_v54 = vsel %vm443_vm13, %v442_v52, %v382_v35  ;;  %v529_v63 = vmax.f32 %v511_v62, %v524_v56 }
 0x1a1   : > { %491 = vmatpush.bf16.msra.mxu0 %v445_v53  ;;  %504 = vmatpush.bf16.msra.mxu1 %v448_v54 }
 0x1a2   : > { %v549_v8 = vmax.f32 %v529_v63, %v544_v7 }
 0x1a4   : > { %v542_v0 = vpop.permute.xlu0 %541 }
 0x1a5   : > { %492 = vmatpush.bf16.msra.mxu0 %v432_v59  ;;  %505 = vmatpush.bf16.msra.mxu1 %v436_v60  ;;  %v522_v1 = vpop.permute.xlu1 %521  ;;  %v545_v36 = vsel %vm368_vm12, %v770_v57, %v542_v0 }
 0x1a6   : > { %v525_v4 = vsel %vm356_vm10, %v765_v47, %v522_v1  ;;  %v531_v5 = vmax.f32 %v891_v2, %v522_v1 }
 0x1a7   : > { %v530_v6 = vmax.f32 %v512_v61, %v525_v4 }
 0x1a8   : > { %v551_v62 = vmax.f32 %v531_v5, %v542_v0  ;;  %735 = vmatmul.msk.bf16.vlgmr.msra.gmra.mxu0 %vm477_vm14, %v476_v3  ;;  %736 = vmatmul.msk.bf16.vlgmr.msra.gmra.mxu1 %vm477_vm14, %v476_v3 }
 0x1a9   : > { %v550_v9 = vmax.f32 %v530_v6, %v545_v36 }
 0x1aa   : > { %v553_v10 = vpack.c.bf16 %v551_v62, %v551_v62 }
 0x1ab   : > { %v771_v12 = vpack.i.bf16 %v550_v9, %v549_v8 }
 0x1ac   : > { %v556_v11 = vunpack.c.l.bf16 %v553_v10 }
 0x1ad   : > { %772 = vrot.lane.b32.xlu1 %v771_v12, %s789_s15 }
 0x1ae   : > { %564 = vrot.lane.b32.xlu2 %v556_v11, %s789_s15 }
 0x208   : > { %v565_v15 = vpop.permute.xlu2 %564 }
 0x21f   : > { %v773_v2 = vpop.permute.xlu1 %772 }
 0x220   : > { %v775_v39 = vunpack.i.h.bf16 %v773_v2  ;;  %v774_v61 = vunpack.i.l.bf16 %v773_v2 }
 0x222   : > { %v567_v20 = vsel %vm380_vm8, %v774_v61, %v775_v39  ;;  %v568_v21 = vsel %vm380_vm8, %v775_v39, %v565_v15 }
 0x223   : > { %v578_v23 = vsel %vm438_vm11, %v567_v20, 0.0  ;;  %v579_v24 = vsel %vm438_vm11, %v568_v21, 0.0  ;;  %v572_v25 = vpack.c.bf16 %v568_v21, %v567_v20  ;;  %v589_v27 = vmul.f32 %v567_v20, %v567_v20 }
 0x224   : > { %v580_v26 = vadd.f32 %v579_v24, %v578_v23  ;;  %v590_v28 = vmul.f32 %v568_v21, %v568_v21 }
 0x225   : > { %v494_v13 = vpop.f32.mrf.mxu0  ;;  %v507_v14 = vpop.f32.mrf.mxu1  ;;  %574 = vst [vmem:[%s266_s23 + $0x8] sm:$0x11] %v572_v25  ;;  %v594_v31 = vsel %vm438_vm11, %v589_v27, 0.0 }
 0x226   : > { %v571_v16 = vpack.c.bf16 %v507_v14, %v494_v13  ;;  %v575_v17 = vadd.f32 %v507_v14, %v494_v13  ;;  %v587_v18 = vmul.f32 %v494_v13, %v494_v13  ;;  %v588_v19 = vmul.f32 %v507_v14, %v507_v14  ;;  %581 = vadd.xlane.f32.xlu1 %v580_v26 }
 0x227   : > { %v595_v32 = vsel %vm438_vm11, %v590_v28, 0.0 }
 0x228   : > { %573 = vst [vmem:[%s266_s23] sm:$0xff] %v571_v16  ;;  %576 = vadd.xlane.f32.xlu0 %v575_v17  ;;  %v591_v22 = vadd.f32 %v588_v19, %v587_v18  ;;  %v596_v33 = vadd.f32 %v595_v32, %v594_v31 }
 0x22a   : > { %592 = vadd.xlane.f32.xlu2 %v591_v22 }
 0x22d   : > { %v496_v29 = vpop.f32.mrf.mxu0  ;;  %v509_v30 = vpop.f32.mrf.mxu1 }
 0x232   : > { %597 = vadd.xlane.f32.xlu2 %v596_v33 }
 0x299   : > { %v582_v37 = vpop.xlane.xlu1 %581 }
 0x29a   : > { %586 = vst.msk [vmem:[%s271_s26 + $0x8] sm:$0x3] %vm585_vm0, %v582_v37 }
 0x29b   : > { %v577_v34 = vpop.xlane.xlu0 %576 }
 0x29c   : > { %584 = vst.msk [vmem:[%s271_s26] sm:$0xff] %vm583_vm15, %v577_v34 }
 0x29d   : > { %v593_v35 = vpop.xlane.xlu2 %592 }
 0x29e   : > { %599 = vst.msk [vmem:[%s276_s29] sm:$0xff] %vm583_vm15, %v593_v35 }
 0x2a5   : > { %v598_v38 = vpop.xlane.xlu2 %597 }
 0x2a6   : > { %600 = vst.msk [vmem:[%s276_s29 + $0x8] sm:$0x3] %vm585_vm0, %v598_v38 }
 0x2a7 PF: > { %s17_s21 = sadd.s32 1, %s782_s21  }
 0x2a8   : > { %p14_p4 = scmp.ge.s32.totalorder %s17_s21, 4  }
 0x2aa   :  { %16 = sbr.rel (!%p14_p4) target bundleno = 1 (0x1), region = 90 }

// kernel: _lambda_.5
= control target key start
LH: loop header
LB: loop body
LE: loop exit
PB: predicated region body
PF: predicated region fallthrough
CT: control target
= control target key end

     0   :  { %s517_s21 = smov 0   ;;  %s569_s0 = inlined_call_operand.vmem [shape: bf16[2,10,256], index: 0, kind: input, shape index: {}]   ;;  %s570_s1 = inlined_call_operand.vmem [shape: bf16[2,14,256], index: 1, kind: input, shape index: {}]   ;;  %s571_s2 = inlined_call_operand.vmem [shape: f32[10,1], index: 2, kind: input, shape index: {}]   ;;  %s572_s3 = inlined_call_operand.vmem [shape: f32[10,1], index: 3, kind: input, shape index: {}]   ;;  %s573_s4 = inlined_call_operand.vmem [shape: f32[14,1], index: 4, kind: input, shape index: {}]   ;;  %s574_s5 = inlined_call_operand.vmem [shape: f32[14,1], index: 5, kind: input, shape index: {}]   ;;  %s575_s6 = inlined_call_operand.vmem [shape: f32[2,12,256], index: 6, kind: output, shape index: {}]  }
   0x1 LB: > { %s445_s22 = sadd.s32 4294967295, %s479_s21   ;;  %p449_p0 = scmp.ge.s32.totalorder %s479_s21, 1  ;;  %s479_s21 = sphi %s517_s21, %s16_s21  }
   0x2   : > { %p222_p1 = scmp.lt.s32.totalorder %s479_s21, 3 }
   0x4   : > { %p223_p2 = pnand %p449_p0, %p222_p1 }
   0x5   : > { %p257_p3 = scmp.lt.s32.totalorder (!%p223_p2), %s445_s22, 1 }
   0x6   : > { %226 = sbr.rel (%p223_p2) target bundleno = 152 (0x98), region = 44 }
   0xb   : > { %v316_v0 = vld [vmem:[%s573_s4] sm:$0xff]  ;;  %v279_v1 = vld [vmem:[%s571_s2 + $0x8] sm:$0x3]  ;;  %v481_v2 = vmov 0   ;;  %s577_s22 = smov (!%p257_p3, %s445_s22), 1  ;;  %vm354_vm0 = vcmask 1041408  }
   0xc   : > { %471 = vset.pattern.permute.xlu1 %v481_v2  ;;  %470 = vset.pattern.permute.xlu0 %v481_v2  ;;  %v333_v3 = vld [vmem:[%s574_s5 + $0x8] sm:$0x3f]  ;;  %v332_v5 = vld [vmem:[%s574_s5] sm:$0xff]  ;;  %s458_s15 = sshll.u32 %s577_s22, 4  ;;  %vm359_vm1 = vcmask 1045504   ;;  %s460_s24 = sshll.u32 %s577_s22, 5 }
   0xd   : > { %320 = vperm.xlu0 %470, %v316_v0   ;;  %287 = vperm.xlu1 %471, %v279_v1   ;;  %v317_v4 = vld [vmem:[%s573_s4 + $0x8] sm:$0x3f]  ;;  %v278_v6 = vld [vmem:[%s571_s2] sm:$0xff]  ;;  %s266_s18 = scalar_lea.vmem %s570_s1, %s458_s15  ;;  %s261_s23 = scalar_lea.vmem %s569_s0, %s458_s15 }
   0xe   : > { %472 = vset.pattern.permute.xlu2 %v481_v2  ;;  %v295_v7 = vld [vmem:[%s572_s3 + $0x8] sm:$0x3]  ;;  %v294_v8 = vld [vmem:[%s572_s3] sm:$0xff]  ;;  %s271_s27 = scalar_lea.vmem %s575_s6, %s460_s24 }
   0xf   : > { %341 = vperm.xlu2 %472, %v333_v3   ;;  %v311_v12 = vld [vmem:[%s266_s18 + $0x8] sm:$0x77]  ;;  %v310_v13 = vld [vmem:[%s266_s18] sm:$0xff] }
  0x10   : > { %v314_v14 = vunpack.c.l.bf16 %v311_v12  ;;  %v315_v15 = vunpack.c.h.bf16 %v311_v12  ;;  %v312_v16 = vunpack.c.l.bf16 %v310_v13  ;;  %v313_v17 = vunpack.c.h.bf16 %v310_v13  ;;  %v273_v18 = vld [vmem:[%s261_s23 + $0x8] sm:$0x11]  ;;  %v272_v19 = vld [vmem:[%s261_s23] sm:$0xff] }
  0x11   : > { %v276_v26 = vunpack.c.l.bf16 %v273_v18  ;;  %v274_v27 = vunpack.c.l.bf16 %v272_v19  ;;  %v277_v28 = vunpack.c.h.bf16 %v273_v18  ;;  %v275_v30 = vunpack.c.h.bf16 %v272_v19 }
  0x15   : > { %325 = vperm.xlu0 %470, %v317_v4   ;;  %336 = vperm.xlu1 %471, %v332_v5  }
  0x17   : > { %282 = vperm.xlu2 %472, %v278_v6  }
  0x1d   : > { %303 = vperm.xlu0 %470, %v295_v7   ;;  %298 = vperm.xlu1 %471, %v294_v8  }
  0x69   : > { %v342_v11 = vpop.permute.xlu2 %341 }
  0x71   : > { %v283_v29 = vpop.permute.xlu2 %282 }
  0x72   : > { %v290_v35 = vmul.f32 %v283_v29, %v274_v27  ;;  %v291_v39 = vmul.f32 %v283_v29, %v275_v30 }
  0x7f   : > { %v321_v9 = vpop.permute.xlu0 %320  ;;  %v288_v10 = vpop.permute.xlu1 %287 }
  0x80   : > { %v328_v24 = vmul.f32 %v321_v9, %v312_v16  ;;  %v329_v25 = vmul.f32 %v321_v9, %v313_v17  ;;  %v292_v37 = vmul.f32 %v288_v10, %v276_v26  ;;  %v293_v38 = vmul.f32 %v288_v10, %v277_v28 }
  0x87   : > { %v326_v20 = vpop.permute.xlu0 %325  ;;  %v337_v21 = vpop.permute.xlu1 %336 }
  0x88   : > { %v330_v22 = vmul.f32 %v326_v20, %v314_v14  ;;  %v331_v23 = vmul.f32 %v326_v20, %v315_v15  ;;  %v344_v33 = vadd.f32 %v337_v21, %v328_v24  ;;  %v345_v34 = vadd.f32 %v337_v21, %v329_v25 }
  0x8a   : > { %v346_v31 = vadd.f32 %v342_v11, %v330_v22  ;;  %v347_v32 = vadd.f32 %v342_v11, %v331_v23  ;;  %v350_v41 = vrot.slane %v344_v33, 6  ;;  %v351_v42 = vrot.slane %v345_v34, 6 }
  0x8b   : > { %v360_v43 = vrot.slane %v344_v33, 2  ;;  %v363_v44 = vrot.slane %v345_v34, 2 }
  0x8c   : > { %v361_v36 = vrot.slane %v346_v31, 2  ;;  %v364_v40 = vrot.slane %v347_v32, 2 }
  0x8e   : > { %v362_v51 = vsel %vm359_vm1, %v360_v43, %v361_v36  ;;  %v365_v54 = vsel %vm359_vm1, %v363_v44, %v364_v40 }
  0x8f   : > { %v304_v45 = vpop.permute.xlu0 %303  ;;  %v299_v46 = vpop.permute.xlu1 %298 }
  0x90   : > { %v308_v47 = vadd.f32 %v304_v45, %v292_v37  ;;  %v309_v48 = vadd.f32 %v304_v45, %v293_v38  ;;  %v306_v49 = vadd.f32 %v299_v46, %v290_v35  ;;  %v307_v50 = vadd.f32 %v299_v46, %v291_v39 }
  0x92   : > { %v355_v52 = vsel %vm354_vm0, %v308_v47, %v350_v41  ;;  %v356_v53 = vsel %vm354_vm0, %v309_v48, %v351_v42  ;;  %v370_v55 = vadd.f32 %v362_v51, %v306_v49  ;;  %v371_v58 = vadd.f32 %v365_v54, %v307_v50 }
  0x93   : > { %v372_v56 = vadd.f32 %v361_v36, %v355_v52  ;;  %v373_v57 = vadd.f32 %v364_v40, %v356_v53 }
  0x94   : > { %374 = vst [vmem:[%s271_s27] sm:$0xff] %v370_v55 }
  0x95   : > { %376 = vst [vmem:[%s271_s27 + $0x10] sm:$0xf] %v372_v56 }
  0x96   : > { %377 = vst [vmem:[%s271_s27 + $0x18] sm:$0xf] %v373_v57 }
  0x97   : > { %375 = vst [vmem:[%s271_s27 + $0x8] sm:$0xff] %v371_v58 }
  0x98 PF: > { %s16_s21 = sadd.s32 1, %s479_s21  }
  0x99   : > { %p13_p4 = scmp.ge.s32.totalorder %s16_s21, 4  }
  0x9b   :  { %15 = sbr.rel (!%p13_p4) target bundleno = 1 (0x1), region = 77 }

</bundles_post_ra>
